<compile_context>
chip_gen: v6e
topology: v6e:2x2x1
jax: 0.10.0
libtpu: 0.0.40
codegen_flags: <defaults>
</compile_context>

<pallas_src>
import functools
import math

import jax
import jax.numpy as jnp
from jax.experimental import pallas as pl
from jax.experimental.pallas import tpu as pltpu


# ----------------------------------------------------------------------------
# small helpers
# ----------------------------------------------------------------------------
def _round_up(x, m):
    return ((x + m - 1) // m) * m


def _balanced_tile(dim, cap, align):
    """Tile size <= cap, multiple of `align`, chosen so the last tile is mostly
    full (e.g. dim=264, cap=256 -> 136, not 256 padded to 512)."""
    dim_a = _round_up(max(dim, 1), align)
    cap_a = max(align, (min(cap, dim_a) // align) * align)
    n_tiles = -(-dim_a // cap_a)
    return _round_up(-(-dim_a // n_tiles), align)


def _vmem_budget_bytes():
    """Per-generation usable VMEM for this kernel's buffers."""
    try:
        cap = int(pltpu.get_tpu_info().vmem_capacity_bytes)
    except Exception:
        cap = 64 * 2**20  # conservative fallback (v7x per-TensorCore VMEM)
    # ~75% of physical: ~96 MiB on v5e/v6e (128 MiB), ~48 MiB on v7x (64 MiB).
    return min(int(cap * 3 // 4), 100 * 2**20)


# ----------------------------------------------------------------------------
# kernels
# ----------------------------------------------------------------------------
def _kresident_kernel(x_ref, w_ref, b_ref, o_ref):
    # Full-K block: one MXU matmul, bias folded in f32, single cast + store.
    acc = jnp.dot(x_ref[...], w_ref[...], preferred_element_type=jnp.float32)
    o_ref[...] = (acc + b_ref[...].astype(jnp.float32)).astype(o_ref.dtype)


def _ktiled_kernel(x_ref, w_ref, b_ref, o_ref, acc_ref):
    # Grid: (M, N, K) with K trailing ("arbitrary"); acc_ref resident across K.
    k = pl.program_id(2)
    prod = jnp.dot(x_ref[...], w_ref[...], preferred_element_type=jnp.float32)

    @pl.when(k == 0)
    def _():
        # Init-with-dot (+ bias fold): no zero store, no epilogue bias add.
        acc_ref[...] = prod + b_ref[...].astype(jnp.float32)

    @pl.when(k > 0)
    def _():
        acc_ref[...] += prod

    @pl.when(k == pl.num_programs(2) - 1)
    def _():
        o_ref[...] = acc_ref[...].astype(o_ref.dtype)


# ----------------------------------------------------------------------------
# fused pallas_call wrapper
# ----------------------------------------------------------------------------
@functools.partial(jax.jit, static_argnames=("tm", "tn", "tk", "force_tiled"))
def _linear_split_fused(x, w_cat, b_cat, *, tm=256, tn=512, tk=1024,
                        force_tiled=False):
    """x: (B, In), w_cat: (In, N), b_cat: (N,) -> (B, N) in x.dtype."""
    B, In = x.shape
    In_w, N = w_cat.shape
    assert In_w == In, "w_cat must be (In, num_splits*Out)"
    out_dtype = x.dtype
    cdt = w_cat.dtype                       # MXU input dtype (e.g. bf16)
    x = x.astype(cdt)

    isz = jnp.dtype(cdt).itemsize
    out_isz = jnp.dtype(out_dtype).itemsize
    b_isz = jnp.dtype(b_cat.dtype).itemsize

    lane = 128
    m_align = 16 if isz < 4 else 8          # bf16 packs 2 rows per sublane
    budget = _vmem_budget_bytes()

    # ---- tile selection -----------------------------------------------------
    tm_e = _balanced_tile(B, tm, m_align)
    Np_full = _round_up(N, lane)
    Kp_full = _round_up(In, lane)           # conservative VMEM estimate for K

    def resident_bytes(tn_c):
        return (2 * tm_e * Kp_full * isz        # x tiles (double buffered)
                + 2 * Kp_full * tn_c * isz      # full-K weight column block
                + 2 * tn_c * b_isz              # bias row
                + 2 * tm_e * tn_c * out_isz)    # output tiles

    use_resident = False
    tn_e = None
    if not force_tiled:
        if resident_bytes(Np_full) <= budget:
            use_resident, tn_e = True, Np_full
        else:
            tn_try = _balanced_tile(N, tn, lane)
            if resident_bytes(tn_try) <= budget:
                use_resident, tn_e = True, tn_try

    if use_resident:
        # K is kept whole (block K == full In, no K padding, no accumulator).
        num_m_tiles = _round_up(B, tm_e) // tm_e
        if num_m_tiles == 1 and tn_e == Np_full and Np_full >= 2 * lane:
            # Guarantee >=2 parallel blocks so v7x's 2nd TensorCore has work.
            tn_e = _balanced_tile(N, max(lane, Np_full // 2), lane)

        Mp = _round_up(B, tm_e)
        Np = _round_up(N, tn_e)
        Kp = In

        grid = (Mp // tm_e, Np // tn_e)
        in_specs = [
            pl.BlockSpec((tm_e, In), lambda i, j: (i, 0)),
            pl.BlockSpec((In, tn_e), lambda i, j: (0, j)),
            pl.BlockSpec((1, tn_e), lambda i, j: (0, j)),
        ]
        out_spec = pl.BlockSpec((tm_e, tn_e), lambda i, j: (i, j))
        kernel = _kresident_kernel
        scratch = []
        dim_sem = ("parallel", "parallel")
        needed = resident_bytes(tn_e)
    else:
        tn_e = _balanced_tile(N, tn, lane)
        tk_e = _balanced_tile(In, tk, lane)
        Mp = _round_up(B, tm_e)
        Np = _round_up(N, tn_e)
        Kp = _round_up(In, tk_e)

        grid = (Mp // tm_e, Np // tn_e, Kp // tk_e)
        in_specs = [
            pl.BlockSpec((tm_e, tk_e), lambda i, j, k: (i, k)),
            pl.BlockSpec((tk_e, tn_e), lambda i, j, k: (k, j)),
            pl.BlockSpec((1, tn_e), lambda i, j, k: (0, j)),
        ]
        out_spec = pl.BlockSpec((tm_e, tn_e), lambda i, j, k: (i, j))
        kernel = _ktiled_kernel
        scratch = [pltpu.VMEM((tm_e, tn_e), jnp.float32)]
        dim_sem = ("parallel", "parallel", "arbitrary")
        needed = (2 * (tm_e * tk_e + tk_e * tn_e) * isz
                  + 2 * tn_e * b_isz
                  + 2 * tm_e * tn_e * out_isz
                  + tm_e * tn_e * 4)

    # ---- padding (zero-padded K rows keep results exact; M/N sliced away) ---
    # Note: when params are prepared via prepare_linear_split_params(), the
    # weight pads below are no-ops (relayout fully hoisted out of the call).
    if (Mp, Kp) != (B, In):
        x = jnp.pad(x, ((0, Mp - B), (0, Kp - In)))
    if (Kp, Np) != (In, N):
        w_cat = jnp.pad(w_cat, ((0, Kp - In), (0, Np - N)))
    b_row = b_cat.reshape(1, N)
    if Np != N:
        b_row = jnp.pad(b_row, ((0, 0), (0, Np - N)))

    # ---- VMEM limit tracks the actual footprint, capped per generation ------
    vmem_limit = int(min(max(needed + (4 << 20), 16 << 20), budget))
    vmem_limit = max(vmem_limit, min(needed, budget))

    cost = pl.CostEstimate(
        flops=2 * B * In * N,
        transcendentals=0,
        bytes_accessed=(B * In + In * N) * isz + N * b_isz + B * N * out_isz,
    )

    out_p = pl.pallas_call(
        kernel,
        out_shape=jax.ShapeDtypeStruct((Mp, Np), out_dtype),
        grid_spec=pltpu.PrefetchScalarGridSpec(
            num_scalar_prefetch=0,
            grid=grid,
            in_specs=in_specs,
            out_specs=out_spec,
            scratch_shapes=scratch,
        ),
        compiler_params=pltpu.CompilerParams(
            dimension_semantics=dim_sem,
            vmem_limit_bytes=vmem_limit,
        ),
        cost_estimate=cost,
    )(x, w_cat, b_row)

    return out_p[:B]     # (B, Np); columns beyond N are zero padding


# ----------------------------------------------------------------------------
# user-facing API
# ----------------------------------------------------------------------------
def prepare_linear_split_params(w_stack, b_stack, compute_dtype=jnp.bfloat16):
    """Hoisted (once-per-model) weight relayout.

    w_stack: (S, In, Out), b_stack: (S, Out)  ->
      w_cat: (In, round_up(S*Out, 128)) in `compute_dtype` (None keeps dtype),
      b_cat: (round_up(S*Out, 128),)    in the original bias dtype.
    """
    S, In, Out = w_stack.shape
    N = S * Out
    w_cat = jnp.transpose(w_stack, (1, 0, 2)).reshape(In, N)
    b_cat = b_stack.reshape(N)
    Np = _round_up(N, 128)
    if Np != N:                               # lane-dense output columns
        w_cat = jnp.pad(w_cat, ((0, 0), (0, Np - N)))
        b_cat = jnp.pad(b_cat, (0, Np - N))
    if compute_dtype is not None:
        w_cat = w_cat.astype(compute_dtype)   # bf16 weights: half the HBM bytes
    return w_cat, b_cat, Out


def linear_split_fused(x, w_cat, b_cat, num_splits, output_size, *,
                       tm=256, tn=512, tk=1024, force_tiled=False):
    """Prepared-params fast path. Returns (B, num_splits, output_size)."""
    out = _linear_split_fused(x, w_cat, b_cat, tm=tm, tn=tn, tk=tk,
                              force_tiled=force_tiled)
    B = x.shape[0]
    return out[:, : num_splits * output_size].reshape(B, num_splits, output_size)


def linear_split(x, w_stack, b_stack, *, compute_dtype=jnp.bfloat16, **kw):
    """Matches LinearSplit.forward: returns a list of S arrays of (B, Out).

    For repeated calls, hoist prepare_linear_split_params() out of the loop and
    call linear_split_fused() directly (avoids per-call weight relayout).
    """
    S, In, Out = w_stack.shape
    w_cat, b_cat, _ = prepare_linear_split_params(w_stack, b_stack, compute_dtype)
    out3 = linear_split_fused(x, w_cat, b_cat, S, Out, **kw)
    return [out3[:, s, :] for s in range(S)]


def init_params(key, input_size, output_size, num_splits, dtype=jnp.float32):
    # Mimics torch.nn.Linear default init: U(-1/sqrt(in), 1/sqrt(in)).
    bound = 1.0 / math.sqrt(input_size)
    kw, kb = jax.random.split(key)
    w_stack = jax.random.uniform(
        kw, (num_splits, input_size, output_size), dtype, minval=-bound, maxval=bound
    )
    b_stack = jax.random.uniform(
        kb, (num_splits, output_size), dtype, minval=-bound, maxval=bound
    )
    return w_stack, b_stack


# ----------------------------------------------------------------------------
# self-test
# ----------------------------------------------------------------------------
if __name__ == "__main__":
    key = jax.random.PRNGKey(0)
    k_x, k_p, k_x2, k_p2 = jax.random.split(key, 4)

    ok = True

    # --- test 1: default path (bf16 MXU inputs, K-resident weights) ---------
    batch, input_size, output_size, num_splits = 8, 32, 64, 3
    x = jax.random.normal(k_x, (batch, input_size), jnp.float32)
    w_stack, b_stack = init_params(k_p, input_size, output_size, num_splits)

    outs = linear_split(x, w_stack, b_stack)            # bf16 MXU, f32 accumulate
    outs = [jax.block_until_ready(o) for o in outs]
    for s, o in enumerate(outs):
        ref = x @ w_stack[s] + b_stack[s]
        ok = ok and (o.shape == (batch, output_size))
        ok = ok and bool(jnp.allclose(o, ref, atol=5e-2, rtol=5e-2))  # bf16 tol

    # --- test 2: exact f32 path, forced M/N/K-tiled accumulator kernel ------
    batch2, input_size2 = 8, 384
    x2 = jax.random.normal(k_x2, (batch2, input_size2), jnp.float32)
    w2, b2 = init_params(k_p2, input_size2, output_size, num_splits)
    w_cat2, b_cat2, _ = prepare_linear_split_params(w2, b2, compute_dtype=None)
    out2 = linear_split_fused(x2, w_cat2, b_cat2, num_splits, output_size,
                              tn=128, tk=128, force_tiled=True)
    out2 = jax.block_until_ready(out2)
    ref2 = jnp.einsum("bi,sio->bso", x2, w2) + b2[None]
    ok = ok and (out2.shape == (batch2, num_splits, output_size))
    ok = ok and bool(jnp.allclose(out2, ref2, atol=1e-3, rtol=1e-3))

    if ok:
        print("KERNEL_OK")
</pallas_src>

<mosaic_0001>
module attributes {stable_mosaic.version = 11 : i64} {
  func.func @_kresident_kernel(%arg0: i32, %arg1: i32, %arg2: memref<16x32xbf16, #tpu.memory_space<vmem>>, %arg3: memref<32x128xbf16, #tpu.memory_space<vmem>>, %arg4: memref<1x128xf32, #tpu.memory_space<vmem>>, %arg5: memref<16x128xf32, #tpu.memory_space<vmem>>) attributes {dimension_semantics = [#tpu.dimension_semantics<parallel>, #tpu.dimension_semantics<parallel>], iteration_bounds = array<i64: 1, 2>, scalar_prefetch = 0 : i64, scratch_operands = 0 : i64, tpu.core_type = #tpu.core_type<tc>, window_params = [{transform_indices = @transform_0, window_bounds = array<i64: 16, 32>}, {transform_indices = @transform_1, window_bounds = array<i64: 32, 128>}, {transform_indices = @transform_2, window_bounds = array<i64: 1, 128>}, {transform_indices = @transform_3, window_bounds = array<i64: 16, 128>}]} {
    %c0 = arith.constant 0 : index
    %c0_0 = arith.constant 0 : index
    %0 = vector.load %arg2[%c0, %c0_0] : memref<16x32xbf16, #tpu.memory_space<vmem>>, vector<16x32xbf16>
    %c0_1 = arith.constant 0 : index
    %c0_2 = arith.constant 0 : index
    %1 = vector.load %arg3[%c0_1, %c0_2] : memref<32x128xbf16, #tpu.memory_space<vmem>>, vector<32x128xbf16>
    %cst = arith.constant dense<0.000000e+00> : vector<16x128xf32>
    %2 = tpu.matmul %0, %1, %cst {dimension_numbers = #tpu.dot_dimension_numbers<[1], [0], [0], [1], [0, 0, 1, 1], [], []>} : vector<16x32xbf16>, vector<32x128xbf16>, vector<16x128xf32> -> vector<16x128xf32>
    %c0_3 = arith.constant 0 : index
    %c0_4 = arith.constant 0 : index
    %3 = vector.load %arg4[%c0_3, %c0_4] : memref<1x128xf32, #tpu.memory_space<vmem>>, vector<1x128xf32>
    %4 = vector.broadcast %3 : vector<1x128xf32> to vector<16x128xf32>
    %5 = arith.addf %2, %4 : vector<16x128xf32>
    %c0_5 = arith.constant 0 : index
    %c0_6 = arith.constant 0 : index
    %6 = vector.load %arg5[%c0_5, %c0_6] : memref<16x128xf32, #tpu.memory_space<vmem>>, vector<16x128xf32>
    tpu.vector_store %arg5[%c0_5, %c0_6], %5 {strides = array<i32>} : memref<16x128xf32, #tpu.memory_space<vmem>>, vector<16x128xf32>,
    return
  }
  func.func @transform_0(%arg0: i32, %arg1: i32) -> (i32, i32) {
    %c0_i32 = arith.constant 0 : i32
    %c0_i32_0 = arith.constant 0 : i32
    return %arg0, %c0_i32 : i32, i32
  }
  func.func @transform_1(%arg0: i32, %arg1: i32) -> (i32, i32) {
    %c0_i32 = arith.constant 0 : i32
    %c0_i32_0 = arith.constant 0 : i32
    return %c0_i32, %arg1 : i32, i32
  }
  func.func @transform_2(%arg0: i32, %arg1: i32) -> (i32, i32) {
    %c0_i32 = arith.constant 0 : i32
    %c0_i32_0 = arith.constant 0 : i32
    return %c0_i32, %arg1 : i32, i32
  }
  func.func @transform_3(%arg0: i32, %arg1: i32) -> (i32, i32) {
    %c0_i32 = arith.constant 0 : i32
    return %arg0, %arg1 : i32, i32
  }
}

</mosaic_0001>

<bundles_post_ra>
// kernel: _linear_split_fused.1
= control target key start
LH: loop header
LB: loop body
LE: loop exit
PB: predicated region body
PF: predicated region fallthrough
CT: control target
= control target key end

     0   :  { %8 = vsyncpa [#allocation3], 0  ;;  %s768_s0 = inlined_call_operand.vmem [shape: bf16[16,32], index: 0, kind: input, shape index: {}]   ;;  %s769_s1 = inlined_call_operand.hbm [shape: bf16[32,256], index: 1, kind: input, shape index: {}]   ;;  %s770_s2 = inlined_call_operand.vmem [shape: f32[1,256], index: 2, kind: input, shape index: {}]   ;;  %s771_s3 = inlined_call_operand.vmem [shape: f32[16,256], index: 3, kind: output, shape index: {}]  }
   0x1   :  { %10 = vsyncpa [#allocation3 + $0x1], 0  ;;  %s657_s12 = smov 0   ;;  %s659_s13 = smov 0  }
   0x2   :  { %s661_s14 = smov 0   ;;  %s663_s15 = smov 0  }
   0x3   :  { %s665_s16 = smov 0   ;;  %s667_s17 = smov 0  }
   0x4 LB: > { %s458_s18 = sadd.s32 4294967295, %s629_s17   ;;  %s25_s19 = sadd.s32 1, %s625_s16  ;;  %s629_s17 = sphi %s667_s17, %s16_s17   ;;  %s625_s16 = sphi %s665_s16, %s780_s16   ;;  %s621_s15 = sphi %s663_s15, %s779_s15   ;;  %s617_s14 = sphi %s661_s14, %s778_s14   ;;  %s613_s13 = sphi %s659_s13, %s777_s13   ;;  %s609_s12 = sphi %s657_s12, %s776_s12  }
   0x5   : > { %p26_p0 = scmp.ge.s32.totalorder %s25_s19, 2  ;;  %s61_s20 = sadd.s32 1, %s617_s14 }
   0x6   : > { %p68_p1 = scmp.ne.s32.totalorder %s617_s14, %s613_s13  ;;  %p69_p2 = scmp.eq.s32.totalorder %s629_s17, 0 }
   0x7   : > { %s782_s19 = smov (%p26_p0, %s25_s19), 0  ;;  %p74_p4 = scmp.ne.s32.totalorder %s613_s13, %s609_s12 }
   0x8   : > { %p693_p3 = por %p69_p2, %p68_p1  ;;  %s58_s22 = ssub.s32 %s625_s16, %s782_s19 }
   0x9   : > { %p75_p5 = scmp.eq.s32.totalorder %s458_s18, 0  ;;  %p59_p6 = scmp.eq.s32.totalorder %s58_s22, 0 }
   0xa   : > { %p126_p7 = scmp.eq.s32.totalorder %s458_s18, 1  ;;  %p494_p10 = scmp.lt.s32.totalorder %s629_s17, 2 }
   0xb   : > { %p700_p8 = por %p75_p5, %p74_p4  ;;  %s161_s26 = sand.u32 1, %s617_s14  }
   0xc   : > { %s705_s24 = scalar_select %p59_p6, %s617_s14, %s61_s20  }
   0xd   : > { %p707_p9 = por %p126_p7, %p68_p1  ;;  %s464_s27 = sshll.u32 %s625_s16, 6 }
   0xe   : > { %s463_s28 = sshll.u32 %s161_s26, 4  ;;  %s170_s4 = scalar_lea.hbm %s769_s1, %s464_s27 }
   0xf   : > { %s165_s5 = scalar_lea.vmem [#allocation2], %s463_s28  ;;  %p719_p11 = pnand %p494_p10, %p693_p3 }
  0x10   : > { %s171_s6 = sshll.u32 %s165_s5, 4  ;;  %p465_p12 = scmp.ge.s32.totalorder %s629_s17, 1  ;;  %s172_s6 = int_to_ptr.vmem [resolvable:$true] %s171_s6 }
  0x11   : > { %s162_s8 = scalar_lea.sflag [#allocation3], %s161_s26  ;;  %p553_p13 = pneg %p719_p11 }
  0x12   : > { %s564_s9 = scalar_lea.vmem %s172_s6, 256  ;;  %s631_s10 = smov [#allocation2]  }
  0x13   : > { %p565_p0 = scmp.ne.s32.totalorder %s172_s6, %s564_s9  ;;  %s569_s11 = sshll.u32 %s631_s10, 4  ;;  %s570_s11 = int_to_ptr.vmem [resolvable:$false] %s569_s11 }
  0x14   : > { %s571_s12 = scalar_lea.vmem %s570_s11, 512  ;;  %p572_p4 = scmp.lt.s32.totalorder %s172_s6, %s570_s11 }
  0x15   : > { %p567_p1 = pnand %p565_p0, %p553_p13  ;;  %p573_p5 = scmp.lt.s32.totalorder %s571_s12, %s564_s9 }
  0x17   : > { %p568_p2 = pneg %p567_p1  ;;  %p574_p3 = por %p573_p5, %p572_p4 }
  0x19   : > { %p575_p6 = pnand %p574_p3, %p568_p2 }
  0x1b   : > { %578 = shalt.err (!%p575_p6)
}
  0x1c   : > { %s632_s18 = smov 128   ;;  %s633_s20 = smov 64  }
  0x1d   : > { %s634_s21 = smov 4   ;;  %p185_p7 = scmp.lt.s32.totalorder %s629_s17, 3 }
  0x1e   : > { %493 = dma.hbm_to_vmem [thread:$0]  (!%p719_p11), %s170_s4, 256, %s172_s6, %s162_s8, %s632_s18, %s633_s20, %s634_s21  }
  0x1f   : > { %p186_p10 = pnand %p465_p12, %p185_p7 }
  0x20   : > { %s191_s22 = sand.u32 (!%p186_p10), 1, %s613_s13  }
  0x21   : > { %189 = sbr.rel (%p186_p10) target bundleno = 256 (0x100), region = 32  ;;  %s466_s26 = sshll.u32 (!%p186_p10), %s191_s22, 4 }
  0x22   : > { %s192_s27 = scalar_lea.sflag (!%p186_p10), [#allocation3], %s191_s22  ;;  %s195_s28 = scalar_lea.vmem (!%p186_p10), [#allocation2], %s466_s26 }
  0x26   : > { %604 = dma.done.wait (%p700_p8), %s192_s27, 256  }
  0x27   : > { %606 = vsyncadd (%p700_p8), %s192_s27, 4294967040  ;;  %v635_v0 = vmov 0.0   ;;  %vm636_vm0 = vmmov 0   ;;  %v548_v1 = vld [vmem:[%s195_s28 + $0x8] sm:$0xff]   ;;  %v549_v2 = vld [vmem:[%s195_s28] sm:$0xff]   ;;  %vm266_vm1 = vcmask 261120  }
  0x28   : > { %480 = vmatprep.subr.bf16.mxu0 %v635_v0  ;;  %484 = vmatprep.mubr.msk.bf16.mxu0 %vm636_vm0, %v635_v0  ;;  %v550_v3 = vld [vmem:[%s768_s0] sm:$0xff]   ;;  %p231_p11 = scmp.lt.s32.totalorder %s621_s15, 1  ;;  %s224_s7 = scalar_lea.vmem [#allocation4], %s466_s26 }
  0x29   : > { %481 = vmatpush3.bf16.msra.mxu0 %v548_v1  ;;  %s474_s8 = sshll.u32 (%p707_p9), %s621_s15, 3 }
  0x2a   : > { %482 = vmatprep.subr.bf16.mxu0 %v635_v0  ;;  %s232_s23 = scalar_select %p231_p11, %s621_s15, 1 }
  0x2b   : > { %s324_s11 = scalar_lea.vmem (%p707_p9), %s771_s3, %s474_s8 }
  0x2c   : > { %s233_s6 = scalar_lea.vmem %s770_s2, %s232_s23 }
  0x2d   : > { %483 = vmatpush3.bf16.msra.mxu0 %v549_v2  ;;  %v468_v4 = vld [vmem:[%s233_s6] ss:$0 sm:$0xff] }
  0x30   : > { %485 = vmatmul.mubr.msk.bf16.vlgmr.msra.gmra.mxu0 %vm266_vm1, %v550_v3 }
  0xf0   : > { %v304_v5 = vpop.f32.mrf.mxu0 }
  0xf1   : > { %v305_v6 = vadd.f32 %v468_v4, %v304_v5 }
  0xf2   : > { %v486_v7 = vpop.f32.mrf.mxu0 }
  0xf3   : > { %311 = vst [vmem:[%s224_s7] sm:$0xff] %v305_v6  ;;  %319 = sbr.rel (!%p707_p9) target bundleno = 256 (0x100), region = 40 }
  0xf4   : > { %v307_v8 = vpop.f32.mrf.mxu0 }
  0xf5   : > { %v308_v9 = vadd.f32 %v468_v4, %v307_v8 }
  0xf6   : > { %v487_v10 = vpop.f32.mrf.mxu0 }
  0xf7   : > { %312 = vst [vmem:[%s224_s7 + $0x8] sm:$0xff] %v308_v9 }
  0xfa   : > { %v355_v11 = vld [vmem:[%s224_s7] sm:$0xff] }
  0xfb   : > { %356 = vst [vmem:[%s324_s11] sm:$0xff] %v355_v11 }
  0xfe   : > { %v357_v12 = vld [vmem:[%s224_s7 + $0x8] sm:$0xff] }
  0xff   : > { %358 = vst [vmem:[%s324_s11 + $0x10] sm:$0xff] %v357_v12 }
 0x100 PF: > { %s16_s17 = sadd.s32 1, %s629_s17   ;;  %s776_s12 = smov %s613_s13 }
 0x101   : > { %p13_p8 = scmp.ge.s32.totalorder %s16_s17, 4   ;;  %s777_s13 = smov %s617_s14 }
 0x102   : > { %s778_s14 = smov %s705_s24  ;;  %s779_s15 = smov %s625_s16 }
 0x103   : > { %s780_s16 = smov %s782_s19  ;;  %15 = sbr.rel (!%p13_p8) target bundleno = 4 (0x4), region = 116 }
 0x108   :  { %374 = vsyncpa [#allocation3], 1 }
 0x109   :  { %376 = vsyncpa [#allocation3 + $0x1], 1 }

</bundles_post_ra>
